<compile_context>
chip_gen: v5e
topology: v5e:2x2
jax: 0.10.0
libtpu: 0.0.40
codegen_flags: <defaults>
</compile_context>

<pallas_src>
import functools
import math

import jax
import jax.numpy as jnp
from jax.experimental import pallas as pl
from jax.experimental.pallas import tpu as pltpu


def _round_up(x, m):
    return (x + m - 1) // m * m


# ----------------------------------------------------------------------------
# Pallas kernel: tiled (patches @ W) with f32 accumulator, fused bias + LeakyReLU
# ----------------------------------------------------------------------------
def _matmul_bias_act_kernel(a_ref, w_ref, b_ref, o_ref, acc_ref, *,
                            apply_lrelu, slope):
    k = pl.program_id(2)

    @pl.when(k == 0)
    def _init():
        acc_ref[...] = jnp.zeros_like(acc_ref)

    acc_ref[...] += jnp.dot(a_ref[...], w_ref[...],
                            preferred_element_type=jnp.float32)

    @pl.when(k == pl.num_programs(2) - 1)
    def _epilogue():
        acc = acc_ref[...] + b_ref[...]                  # (TM,TN) + (1,TN) f32
        if apply_lrelu:
            acc = jnp.where(acc >= 0.0, acc, slope * acc)
        o_ref[...] = acc.astype(o_ref.dtype)


def conv_as_matmul(patches, w_pad, b_pad, *, cout, apply_lrelu, out_dtype,
                   slope=0.2):
    """patches: (M, K) bf16;  w_pad: (K_pad, N_pad) bf16;  b_pad: (1, N_pad) f32."""
    M, K = patches.shape
    K_pad, N_pad = w_pad.shape            # already multiples of 128

    # Tile selection: lane dims are multiples of 128, sublane dims multiples of 8.
    TM = 256 if M >= 256 else _round_up(M, 8)
    M_pad = _round_up(M, TM)
    TK = 512 if K_pad % 512 == 0 else (256 if K_pad % 256 == 0 else 128)
    TN = 256 if N_pad % 256 == 0 else 128

    if (M_pad, K_pad) != (M, K):
        patches = jnp.pad(patches, ((0, M_pad - M), (0, K_pad - K)))

    grid = (M_pad // TM, N_pad // TN, K_pad // TK)
    out_itemsize = jnp.dtype(out_dtype).itemsize

    # VMEM: double-buffered bf16 input tiles + output tile + f32 accumulator.
    vmem_need = (2 * TM * TK * 2 + 2 * TK * TN * 2 + 2 * TN * 4
                 + 2 * TM * TN * out_itemsize + TM * TN * 4)
    vmem_limit = int(min(64 * 1024 * 1024, max(4 * vmem_need, 8 * 1024 * 1024)))

    kernel = functools.partial(_matmul_bias_act_kernel,
                               apply_lrelu=apply_lrelu, slope=slope)
    out_pad = pl.pallas_call(
        kernel,
        out_shape=jax.ShapeDtypeStruct((M_pad, N_pad), out_dtype),
        grid=grid,
        in_specs=[
            pl.BlockSpec((TM, TK), lambda i, j, k: (i, k)),
            pl.BlockSpec((TK, TN), lambda i, j, k: (k, j)),
            pl.BlockSpec((1, TN), lambda i, j, k: (0, j)),
        ],
        out_specs=pl.BlockSpec((TM, TN), lambda i, j, k: (i, j)),
        scratch_shapes=[pltpu.VMEM((TM, TN), jnp.float32)],
        compiler_params=pltpu.CompilerParams(
            dimension_semantics=("parallel", "parallel", "arbitrary"),
            vmem_limit_bytes=vmem_limit,
        ),
        cost_estimate=pl.CostEstimate(
            flops=2 * M_pad * K_pad * N_pad,
            transcendentals=0,
            bytes_accessed=(M_pad * K_pad * 2 + K_pad * N_pad * 2
                            + M_pad * N_pad * out_itemsize),
        ),
    )(patches, w_pad, b_pad)
    return out_pad[:M, :cout]


# ----------------------------------------------------------------------------
# Glue: reflection pad + im2col (static slices in plain JAX, bf16 activations)
# ----------------------------------------------------------------------------
def reflect_pad_nhwc(x, p=1):
    # jnp.pad mode="reflect" == nn.ReflectionPad2d (edge not repeated)
    return jnp.pad(x, ((0, 0), (p, p), (p, p), (0, 0)), mode="reflect")


def im2col(x, k, stride):
    """x: (N, H, W, C) -> patches (N*Ho*Wo, k*k*C), patch order (ki, kj, c)."""
    N, H, W, C = x.shape
    Ho = (H - k) // stride + 1
    Wo = (W - k) // stride + 1
    slices = []
    for di in range(k):
        for dj in range(k):
            slices.append(
                x[:, di:di + stride * Ho:stride, dj:dj + stride * Wo:stride, :]
            )
    p = jnp.stack(slices, axis=-2)               # (N, Ho, Wo, k*k, C)
    return p.reshape(N * Ho * Wo, k * k * C), (N, Ho, Wo)


# ----------------------------------------------------------------------------
# Parameter setup (deterministic, synthetic) + spectral norm
# ----------------------------------------------------------------------------
def spectral_normalize(w, u0, n_iter=1, eps=1e-12):
    """PyTorch-style spectral norm: one power iteration on W.reshape(Cout, -1)."""
    cout = w.shape[0]
    w_mat = w.reshape(cout, -1)
    u = u0 / (jnp.linalg.norm(u0) + eps)
    v = None
    for _ in range(n_iter):
        v = w_mat.T @ u
        v = v / (jnp.linalg.norm(v) + eps)
        u = w_mat @ v
        u = u / (jnp.linalg.norm(u) + eps)
    sigma = jnp.dot(u, w_mat @ v)
    return w / sigma


def init_params(key, input_nc, ndf):
    # (cin, cout, stride, has_bias) for the 5 conv layers of PatchDiscriminator
    specs = [
        (input_nc, ndf,      2, True),
        (ndf,      ndf * 2,  2, True),
        (ndf * 2,  ndf * 4,  2, True),
        (ndf * 4,  ndf * 8,  1, True),
        (ndf * 8,  input_nc, 1, False),   # final conv: bias=False, no LeakyReLU
    ]
    params = []
    for cin, cout, stride, has_bias in specs:
        key, wk, bk, uk = jax.random.split(key, 4)
        fan_in = cin * 4 * 4
        bound = 1.0 / math.sqrt(fan_in)
        w = jax.random.uniform(wk, (cout, cin, 4, 4), jnp.float32, -bound, bound)
        if has_bias:
            b = jax.random.uniform(bk, (cout,), jnp.float32, -bound, bound)
        else:
            b = jnp.zeros((cout,), jnp.float32)
        u0 = jax.random.normal(uk, (cout,), jnp.float32)
        w_sn = spectral_normalize(w, u0)

        # OIHW -> (kh, kw, cin, cout) -> (16*cin, cout): matches im2col order.
        K = 16 * cin
        K_pad = _round_up(K, 128)
        N_pad = _round_up(cout, 128)
        w_mat = jnp.transpose(w_sn, (2, 3, 1, 0)).reshape(K, cout)
        w_pad = (jnp.zeros((K_pad, N_pad), jnp.float32)
                 .at[:K, :cout].set(w_mat).astype(jnp.bfloat16))
        b_pad = jnp.zeros((1, N_pad), jnp.float32).at[0, :cout].set(b)

        params.append(dict(w_oihw=w_sn, w_pad=w_pad, b_pad=b_pad, b=b,
                           cout=cout, stride=stride))
    return params


# ----------------------------------------------------------------------------
# Forward pass (Pallas path)
# ----------------------------------------------------------------------------
def patch_discriminator_forward(x_nchw, params):
    x = jnp.transpose(x_nchw, (0, 2, 3, 1)).astype(jnp.bfloat16)   # NCHW -> NHWC
    n_layers = len(params)
    for i, p in enumerate(params):
        xp = reflect_pad_nhwc(x, 1)
        patches, (N, Ho, Wo) = im2col(xp, 4, p["stride"])
        is_last = (i == n_layers - 1)
        y = conv_as_matmul(
            patches, p["w_pad"], p["b_pad"],
            cout=p["cout"],
            apply_lrelu=not is_last,
            out_dtype=jnp.float32 if is_last else jnp.bfloat16,
        )
        x = y.reshape(N, Ho, Wo, p["cout"])
    return jnp.transpose(x, (0, 3, 1, 2))                          # NHWC -> NCHW


# ----------------------------------------------------------------------------
# Pure-JAX reference (lax conv) for correctness cross-check.
# Mirrors the bf16 rounding of inputs / weights / inter-layer activations so the
# comparison isolates the kernel math (f32 accumulation both paths).
# ----------------------------------------------------------------------------
def reference_forward(x_nchw, params):
    x = x_nchw.astype(jnp.bfloat16).astype(jnp.float32)
    n_layers = len(params)
    for i, p in enumerate(params):
        w = p["w_oihw"].astype(jnp.bfloat16).astype(jnp.float32)
        x = jnp.pad(x, ((0, 0), (0, 0), (1, 1), (1, 1)), mode="reflect")
        x = jax.lax.conv_general_dilated(
            x, w, window_strides=(p["stride"], p["stride"]),
            padding="VALID",
            dimension_numbers=("NCHW", "OIHW", "NCHW"),
            precision=jax.lax.Precision.HIGHEST,
        )
        x = x + p["b"].reshape(1, -1, 1, 1)
        if i < n_layers - 1:
            x = jnp.where(x >= 0.0, x, 0.2 * x)
            x = x.astype(jnp.bfloat16).astype(jnp.float32)
    return x


if __name__ == "__main__":
    input_nc, ndf = 4, 8        # small synthetic config (module default ndf=64)
    key = jax.random.PRNGKey(0)
    key, xk, pk = jax.random.split(key, 3)

    # Spatial 32 is the smallest "nice" size keeping all ReflectionPad2d(1)
    # layers valid through the 5-layer stack (output spatial = 2x2).
    x = jax.random.normal(xk, (2, input_nc, 32, 32), jnp.float32)
    params = init_params(pk, input_nc, ndf)

    out = patch_discriminator_forward(x, params)
    out = jax.block_until_ready(out)

    ref = jax.block_until_ready(reference_forward(x, params))
    assert out.shape == ref.shape == (2, input_nc, 2, 2), out.shape
    max_err = float(jnp.max(jnp.abs(out - ref)))
    assert jnp.allclose(out, ref, rtol=1e-2, atol=1e-2), max_err

    print("KERNEL_OK")
</pallas_src>

<mosaic_0001>
module attributes {stable_mosaic.version = 11 : i64} {
  func.func @_matmul_bias_act_kernel(%arg0: i32, %arg1: i32, %arg2: i32, %arg3: memref<256x128xbf16, #tpu.memory_space<vmem>>, %arg4: memref<128x128xbf16, #tpu.memory_space<vmem>>, %arg5: memref<1x128xf32, #tpu.memory_space<vmem>>, %arg6: memref<256x128xbf16, #tpu.memory_space<vmem>>, %arg7: memref<256x128xf32, #tpu.memory_space<vmem>>) attributes {dimension_semantics = [#tpu.dimension_semantics<parallel>, #tpu.dimension_semantics<parallel>, #tpu.dimension_semantics<arbitrary>], iteration_bounds = array<i64: 2, 1, 1>, scalar_prefetch = 0 : i64, scratch_operands = 1 : i64, tpu.core_type = #tpu.core_type<tc>, window_params = [{transform_indices = @transform_0, window_bounds = array<i64: 256, 128>}, {transform_indices = @transform_1, window_bounds = array<i64: 128, 128>}, {transform_indices = @transform_2, window_bounds = array<i64: 1, 128>}, {transform_indices = @transform_3, window_bounds = array<i64: 256, 128>}]} {
    %c0_i32 = arith.constant 0 : i32
    %0 = arith.cmpi eq, %arg2, %c0_i32 : i32
    %1 = arith.extui %0 : i1 to i32
    %c0_i32_0 = arith.constant 0 : i32
    %2 = arith.cmpi ne, %1, %c0_i32_0 : i32
    scf.if %2 {
      %cst_10 = arith.constant 0.000000e+00 : f32
      %12 = vector.broadcast %cst_10 : f32 to vector<256x128xf32>
      %c0_11 = arith.constant 0 : index
      %c0_12 = arith.constant 0 : index
      %13 = vector.load %arg7[%c0_11, %c0_12] : memref<256x128xf32, #tpu.memory_space<vmem>>, vector<256x128xf32>
      tpu.vector_store %arg7[%c0_11, %c0_12], %12 {strides = array<i32>} : memref<256x128xf32, #tpu.memory_space<vmem>>, vector<256x128xf32>,
    } else {
    }
    %c0 = arith.constant 0 : index
    %c0_1 = arith.constant 0 : index
    %3 = vector.load %arg7[%c0, %c0_1] : memref<256x128xf32, #tpu.memory_space<vmem>>, vector<256x128xf32>
    %c0_2 = arith.constant 0 : index
    %c0_3 = arith.constant 0 : index
    %4 = vector.load %arg3[%c0_2, %c0_3] : memref<256x128xbf16, #tpu.memory_space<vmem>>, vector<256x128xbf16>
    %c0_4 = arith.constant 0 : index
    %c0_5 = arith.constant 0 : index
    %5 = vector.load %arg4[%c0_4, %c0_5] : memref<128x128xbf16, #tpu.memory_space<vmem>>, vector<128x128xbf16>
    %cst = arith.constant dense<0.000000e+00> : vector<256x128xf32>
    %6 = tpu.matmul %4, %5, %cst {dimension_numbers = #tpu.dot_dimension_numbers<[1], [0], [0], [1], [0, 0, 1, 1], [], []>} : vector<256x128xbf16>, vector<128x128xbf16>, vector<256x128xf32> -> vector<256x128xf32>
    %7 = arith.addf %3, %6 : vector<256x128xf32>
    %c0_6 = arith.constant 0 : index
    %c0_7 = arith.constant 0 : index
    %8 = vector.load %arg7[%c0_6, %c0_7] : memref<256x128xf32, #tpu.memory_space<vmem>>, vector<256x128xf32>
    tpu.vector_store %arg7[%c0_6, %c0_7], %7 {strides = array<i32>} : memref<256x128xf32, #tpu.memory_space<vmem>>, vector<256x128xf32>,
    %c0_i32_8 = arith.constant 0 : i32
    %9 = arith.cmpi eq, %arg2, %c0_i32_8 : i32
    %10 = arith.extui %9 : i1 to i32
    %c0_i32_9 = arith.constant 0 : i32
    %11 = arith.cmpi ne, %10, %c0_i32_9 : i32
    scf.if %11 {
      %c0_10 = arith.constant 0 : index
      %c0_11 = arith.constant 0 : index
      %12 = vector.load %arg7[%c0_10, %c0_11] : memref<256x128xf32, #tpu.memory_space<vmem>>, vector<256x128xf32>
      %c0_12 = arith.constant 0 : index
      %c0_13 = arith.constant 0 : index
      %13 = vector.load %arg5[%c0_12, %c0_13] : memref<1x128xf32, #tpu.memory_space<vmem>>, vector<1x128xf32>
      %14 = vector.broadcast %13 : vector<1x128xf32> to vector<256x128xf32>
      %15 = arith.addf %12, %14 : vector<256x128xf32>
      %cst_14 = arith.constant 0.000000e+00 : f32
      %16 = vector.broadcast %cst_14 : f32 to vector<256x128xf32>
      %17 = arith.cmpf oge, %15, %16 : vector<256x128xf32>
      %cst_15 = arith.constant 2.000000e-01 : f32
      %18 = vector.broadcast %cst_15 : f32 to vector<256x128xf32>
      %19 = arith.mulf %18, %15 : vector<256x128xf32>
      %20 = arith.select %17, %15, %19 : vector<256x128xi1>, vector<256x128xf32>
      %21 = arith.truncf %20 : vector<256x128xf32> to vector<256x128xbf16>
      %c0_16 = arith.constant 0 : index
      %c0_17 = arith.constant 0 : index
      %22 = vector.load %arg6[%c0_16, %c0_17] : memref<256x128xbf16, #tpu.memory_space<vmem>>, vector<256x128xbf16>
      tpu.vector_store %arg6[%c0_16, %c0_17], %21 {strides = array<i32>} : memref<256x128xbf16, #tpu.memory_space<vmem>>, vector<256x128xbf16>,
    } else {
    }
    return
  }
  func.func @transform_0(%arg0: i32, %arg1: i32, %arg2: i32) -> (i32, i32) {
    %c0_i32 = arith.constant 0 : i32
    return %arg0, %arg2 : i32, i32
  }
  func.func @transform_1(%arg0: i32, %arg1: i32, %arg2: i32) -> (i32, i32) {
    %c0_i32 = arith.constant 0 : i32
    return %arg2, %arg1 : i32, i32
  }
  func.func @transform_2(%arg0: i32, %arg1: i32, %arg2: i32) -> (i32, i32) {
    %c0_i32 = arith.constant 0 : i32
    %c0_i32_0 = arith.constant 0 : i32
    return %c0_i32, %arg1 : i32, i32
  }
  func.func @transform_3(%arg0: i32, %arg1: i32, %arg2: i32) -> (i32, i32) {
    %c0_i32 = arith.constant 0 : i32
    return %arg0, %arg1 : i32, i32
  }
}

</mosaic_0001>

<bundles_post_ra>
// kernel: tpu_custom_call.1
= control target key start
LH: loop header
LB: loop body
LE: loop exit
PB: predicated region body
PF: predicated region fallthrough
CT: control target
= control target key end

     0   :  { %s1778_s0 = inlined_call_operand.hbm [shape: bf16[512,128], index: 0, kind: input, shape index: {}]   ;;  %s1779_s1 = inlined_call_operand.hbm [shape: bf16[128,128], index: 1, kind: input, shape index: {}]   ;;  %s1780_s2 = inlined_call_operand.vmem [shape: f32[1,128], index: 2, kind: input, shape index: {}]   ;;  %s1781_s3 = inlined_call_operand.hbm [shape: bf16[512,128], index: 3, kind: output, shape index: {}]  }
   0x1   :  { %1783 = sst [smem:[#allocation12_spill]] %s1779_s1 }
   0x2   :  { %8 = vsyncpa [#allocation4], 0 }
   0x3   :  { %10 = vsyncpa [#allocation4 + $0x1], 0 }
   0x4   :  { %11 = vsyncpa [#allocation7], 0 }
   0x5   :  { %12 = vsyncpa [#allocation5], 0 }
   0x6   :  { %14 = vsyncpa [#allocation5 + $0x1], 0  ;;  %s1545_s12 = smov 0   ;;  %s1547_s13 = smov 0  }
   0x7   :  { %s1549_s14 = smov 0   ;;  %s1551_s15 = smov 0  }
   0x8   :  { %s1553_s16 = smov 0   ;;  %s1555_s17 = smov 0  }
   0x9 LB: > { %s1035_s18 = sadd.s32 4294967295, %s1518_s17   ;;  %s1036_s19 = sadd.s32 4294967294, %s1518_s17   ;;  %s1518_s17 = sphi %s1555_s17, %s20_s17   ;;  %s1514_s16 = sphi %s1553_s16, %s1797_s16   ;;  %s1510_s15 = sphi %s1551_s15, %s1796_s15   ;;  %s1506_s14 = sphi %s1549_s14, %s1795_s14   ;;  %s1502_s13 = sphi %s1547_s13, %s1794_s13   ;;  %s1498_s12 = sphi %s1545_s12, %s1793_s12  }
   0xa   : > { %p61_p0 = scmp.ne.s32.totalorder %s1502_s13, %s1498_s12  ;;  %p1579_p1 = scmp.eq.s32.totalorder %s1035_s18, 0 }
   0xb   : > { %p1583_p2 = scmp.eq.s32.totalorder %s1035_s18, 1  ;;  %p147_p3 = scmp.eq.s32.totalorder %s1036_s19, 1 }
   0xc   : > { %p1589_p4 = por %p1579_p1, %p61_p0  ;;  %p1037_p5 = scmp.ge.s32.totalorder %s1518_s17, 1 }
   0xd   : > { %p1594_p6 = por %p147_p3, %p61_p0  ;;  %p154_p7 = scmp.lt.s32.totalorder %s1518_s17, 3 }
   0xe   : > { %s1788_s1 = sld [smem:[#allocation12_spill]]  ;;  %s1520_s28 = smov [#allocation6]  }
   0xf   : > { %p1602_p8 = pnand %p1037_p5, %p154_p7  ;;  %s171_s29 = sshll.u32 %s1520_s28, 4  ;;  %s172_s29 = int_to_ptr.vmem [resolvable:$true] %s171_s29 }
  0x10   : > { %p1040_p11 = scmp.ge.s32.totalorder %s1518_s17, 2  ;;  %s1782_s30 = smov 64  }
  0x11   : > { %p1302_p9 = pneg %p1602_p8  ;;  %s1522_s4 = smov 4  }
  0x12   : > { %s39_s5 = sadd.s32 1, %s1514_s16  ;;  %s48_s6 = sadd.s32 1, %s1506_s14 }
  0x13   : > { %p1303_p10 = pnand %p1302_p9, %p1579_p1  ;;  %p41_p12 = scmp.ge.s32.totalorder %s39_s5, 2 }
  0x14   : > { %s169_s26 = sshll.u32 %s1788_s1, 4  ;;  %p55_p13 = scmp.ne.s32.totalorder %s1506_s14, %s1502_s13  ;;  %s170_s26 = int_to_ptr.hbm [resolvable:$true] %s169_s26 }
  0x15   : > { %1305 = dma.hbm_to_vmem [thread:$0]  (!%p1303_p10), %s170_s26, 1024, %s172_s29, [#allocation7], %s1782_s30, %s1782_s30, %s1522_s4  }
  0x16   : > { %p56_p0 = scmp.eq.s32.totalorder %s1518_s17, 0  ;;  %s1799_s5 = smov (%p41_p12, %s39_s5), 0 }
  0x17   : > { %p1627_p5 = por %p1583_p2, %p55_p13  ;;  %s43_s9 = ssub.s32 %s1514_s16, %s1799_s5 }
  0x18   : > { %p1621_p3 = por %p56_p0, %p55_p13  ;;  %p1315_p7 = scmp.lt.s32.totalorder %s1518_s17, 2 }
  0x19   : > { %p46_p9 = scmp.eq.s32.totalorder %s43_s9, 0  ;;  %s191_s10 = sand.u32 1, %s1506_s14  }
  0x1a   : > { %s1041_s11 = sshll.u32 %s191_s10, 7  ;;  %s1149_s19 = sshll.u32 %s1514_s16, 7 }
  0x1b   : > { %s1636_s18 = scalar_select %p46_p9, %s1506_s14, %s48_s6  }
  0x1c   : > { %s201_s26 = scalar_lea.hbm %s1778_s0, %s1149_s19  ;;  %s195_s28 = scalar_lea.vmem [#allocation3], %s1041_s11 }
  0x1d   : > { %s204_s29 = sshll.u32 %s195_s28, 4  ;;  %s202_s21 = sshll.u32 %s201_s26, 4  ;;  %s205_s29 = int_to_ptr.vmem [resolvable:$true] %s204_s29  ;;  %s203_s21 = int_to_ptr.hbm [resolvable:$true] %s202_s21 }
  0x1e   : > { %p1307_p2 = pnand %p1315_p7, %p1621_p3  ;;  %s192_s30 = scalar_lea.sflag [#allocation4], %s191_s10 }
  0x1f   : > { %s1792_s1 = smov 64   ;;  %216 = sbr.rel (%p1602_p8) target bundleno = 272 (0x110), region = 32 }
  0x20   : > { %1309 = dma.hbm_to_vmem [thread:$0]  (!%p1307_p2), %s203_s21, 2048, %s205_s29, %s192_s30, %s1792_s1, %s1792_s1, %s1522_s4  }
  0x21   : > { %s1650_s6 = sand.u32 (!%p1602_p8), 1, %s1502_s13  }
  0x22   : > { %s1045_s9 = sshll.u32 (!%p1602_p8), %s1650_s6, 7  ;;  %s219_s11 = scalar_lea.sflag (!%p1602_p8), [#allocation4], %s1650_s6 }
  0x23   : > { %s1656_s7 = scalar_lea.vmem (!%p1602_p8), [#allocation3], %s1045_s9 }
  0x24   : > { %1485 = dma.done.wait (%p1589_p4), %s219_s11, 2048  }
  0x25   : > { %1487 = vsyncadd (%p1589_p4), %s219_s11, 4294965248 }
  0x26   : > { %1489 = dma.done.wait (%p1579_p1), [#allocation7], 1024  }
  0x27   : > { %1491 = vsyncadd (%p1579_p1), [#allocation7], 4294966272  ;;  %v1173_v0 = vld [vmem:[#allocation6 + $0x38] sm:$0xff]  ;;  %v1172_v1 = vld [vmem:[#allocation6 + $0x30] sm:$0xff]  ;;  %s1695_s22 = scalar_lea.vmem [#allocation8], %s1045_s9  ;;  %s1174_s27 = sshll.u32 %s1510_s15, 7 }
  0x28   : > { %520 = vmatpush.bf16.msra.mxu0 %v1173_v0  ;;  %1270 = vmatpush.bf16.msra.mxu1 %v1173_v0  ;;  %v1171_v2 = vld [vmem:[#allocation6 + $0x28] sm:$0xff]  ;;  %v1170_v3 = vld [vmem:[#allocation6 + $0x20] sm:$0xff]  ;;  %v1169_v4 = vld [vmem:[#allocation6 + $0x18] sm:$0xff]  ;;  %s917_s15 = scalar_lea.hbm %s1781_s3, %s1174_s27  ;;  %s918_s10 = sshll.u32 %s1695_s22, 4  ;;  %s919_s10 = int_to_ptr.vmem [resolvable:$true] %s918_s10 }
  0x29   : > { %1271 = vmatpush.bf16.msra.mxu2 %v1173_v0  ;;  %1272 = vmatpush.bf16.msra.mxu3 %v1173_v0  ;;  %v1168_v5 = vld [vmem:[#allocation6 + $0x10] sm:$0xff]  ;;  %v1167_v6 = vld [vmem:[#allocation6 + $0x8] sm:$0xff]  ;;  %v1166_v7 = vld [vmem:[#allocation6] sm:$0xff]  ;;  %s920_s19 = sshll.u32 %s917_s15, 4  ;;  %s905_s24 = scalar_lea.sflag [#allocation5], %s1650_s6  ;;  %s921_s19 = int_to_ptr.hbm [resolvable:$true] %s920_s19 }
  0x2a   : > { %v1150_v8 = vld [vmem:[%s1656_s7] sm:$0xff]  ;;  %v1151_v12 = vld [vmem:[%s1656_s7 + $0x8] sm:$0xff]  ;;  %v1152_v16 = vld [vmem:[%s1656_s7 + $0x10] sm:$0xff]  ;;  %s1446_s25 = sshra.s32 %s921_s19, 4  ;;  %s1452_s21 = scalar_lea.hbm %s1781_s3, 256  ;;  %s1447_s25 = int_to_ptr.hbm [resolvable:$true] %s1446_s25 }
  0x2b   : > { %v1154_v9 = vld [vmem:[%s1656_s7 + $0x20] sm:$0xff]  ;;  %v1155_v13 = vld [vmem:[%s1656_s7 + $0x28] sm:$0xff]  ;;  %v1156_v17 = vld [vmem:[%s1656_s7 + $0x30] sm:$0xff]  ;;  %s1448_s26 = scalar_lea.hbm %s1447_s25, 128  ;;  %p1453_p10 = scmp.lt.s32.totalorder %s1447_s25, %s1781_s3 }
  0x2c   : > { %521 = vmatpush.bf16.msra.mxu0 %v1172_v1  ;;  %1273 = vmatpush.bf16.msra.mxu1 %v1172_v1  ;;  %v1158_v10 = vld [vmem:[%s1656_s7 + $0x40] sm:$0xff]  ;;  %v1159_v14 = vld [vmem:[%s1656_s7 + $0x48] sm:$0xff]  ;;  %v1160_v18 = vld [vmem:[%s1656_s7 + $0x50] sm:$0xff]  ;;  %p1449_p1 = scmp.ne.s32.totalorder %s1447_s25, %s1448_s26  ;;  %p1454_p12 = scmp.lt.s32.totalorder %s1452_s21, %s1448_s26 }
  0x2d   : > { %1274 = vmatpush.bf16.msra.mxu2 %v1172_v1  ;;  %1275 = vmatpush.bf16.msra.mxu3 %v1172_v1  ;;  %v1162_v11 = vld [vmem:[%s1656_s7 + $0x60] sm:$0xff]  ;;  %v1163_v15 = vld [vmem:[%s1656_s7 + $0x68] sm:$0xff]  ;;  %v1164_v19 = vld [vmem:[%s1656_s7 + $0x70] sm:$0xff] }
  0x2e   : > { %v1153_v20 = vld [vmem:[%s1656_s7 + $0x18] sm:$0xff]  ;;  %v1685_v26 = vld [vmem:[%s1780_s2] ss:$0 sm:$0xff]  ;;  %p1450_p4 = pnand %p1449_p1, %p1627_p5  ;;  %p1455_p13 = por %p1454_p12, %p1453_p10 }
  0x2f   : > { %v1157_v21 = vld [vmem:[%s1656_s7 + $0x38] sm:$0xff] }
  0x30   : > { %522 = vmatpush.bf16.msra.mxu0 %v1171_v2  ;;  %1276 = vmatpush.bf16.msra.mxu1 %v1171_v2  ;;  %v1161_v22 = vld [vmem:[%s1656_s7 + $0x58] sm:$0xff]  ;;  %p1451_p8 = pneg %p1450_p4 }
  0x31   : > { %1277 = vmatpush.bf16.msra.mxu2 %v1171_v2  ;;  %1278 = vmatpush.bf16.msra.mxu3 %v1171_v2  ;;  %v1165_v23 = vld [vmem:[%s1656_s7 + $0x78] sm:$0xff] }
  0x32   : > { %p1456_p0 = pnand %p1455_p13, %p1451_p8 }
  0x34   : > { %523 = vmatpush.bf16.msra.mxu0 %v1170_v3  ;;  %1279 = vmatpush.bf16.msra.mxu1 %v1170_v3 }
  0x35   : > { %1280 = vmatpush.bf16.msra.mxu2 %v1170_v3  ;;  %1281 = vmatpush.bf16.msra.mxu3 %v1170_v3 }
  0x38   : > { %524 = vmatpush.bf16.msra.mxu0 %v1169_v4  ;;  %1282 = vmatpush.bf16.msra.mxu1 %v1169_v4 }
  0x39   : > { %1283 = vmatpush.bf16.msra.mxu2 %v1169_v4  ;;  %1284 = vmatpush.bf16.msra.mxu3 %v1169_v4 }
  0x3c   : > { %525 = vmatpush.bf16.msra.mxu0 %v1168_v5  ;;  %1285 = vmatpush.bf16.msra.mxu1 %v1168_v5 }
  0x3d   : > { %1286 = vmatpush.bf16.msra.mxu2 %v1168_v5  ;;  %1287 = vmatpush.bf16.msra.mxu3 %v1168_v5 }
  0x40   : > { %526 = vmatpush.bf16.msra.mxu0 %v1167_v6  ;;  %1288 = vmatpush.bf16.msra.mxu1 %v1167_v6 }
  0x41   : > { %1289 = vmatpush.bf16.msra.mxu2 %v1167_v6  ;;  %1290 = vmatpush.bf16.msra.mxu3 %v1167_v6 }
  0x44   : > { %527 = vmatpush.bf16.msra.mxu0 %v1166_v7  ;;  %1291 = vmatpush.bf16.msra.mxu1 %v1166_v7 }
  0x45   : > { %1292 = vmatpush.bf16.msra.mxu2 %v1166_v7  ;;  %1293 = vmatpush.bf16.msra.mxu3 %v1166_v7 }
  0x47   : > { %528 = vmatmul.bf16.vlgmr.msra.gmra.mxu0 %v1150_v8  ;;  %548 = vmatmul.bf16.vlgmr.msra.gmra.mxu1 %v1154_v9 }
  0x48   : > { %568 = vmatmul.bf16.vlgmr.msra.gmra.mxu2 %v1158_v10  ;;  %588 = vmatmul.bf16.vlgmr.msra.gmra.mxu3 %v1162_v11 }
  0x57   : > { %533 = vmatmul.bf16.gmra.mxu0 %v1151_v12  ;;  %553 = vmatmul.bf16.gmra.mxu1 %v1155_v13 }
  0x58   : > { %573 = vmatmul.bf16.gmra.mxu2 %v1159_v14  ;;  %593 = vmatmul.bf16.gmra.mxu3 %v1163_v15 }
  0x67   : > { %538 = vmatmul.bf16.gmra.mxu0 %v1152_v16  ;;  %558 = vmatmul.bf16.gmra.mxu1 %v1156_v17 }
  0x68   : > { %578 = vmatmul.bf16.gmra.mxu2 %v1160_v18  ;;  %598 = vmatmul.bf16.gmra.mxu3 %v1164_v19 }
  0x77   : > { %543 = vmatmul.bf16.gmra.mxu0 %v1153_v20  ;;  %563 = vmatmul.bf16.gmra.mxu1 %v1157_v21 }
  0x78   : > { %583 = vmatmul.bf16.gmra.mxu2 %v1161_v22  ;;  %603 = vmatmul.bf16.gmra.mxu3 %v1165_v23 }
  0xc4   : > { %v529_v24 = vpop.f32.mrf.mxu0  ;;  %v549_v25 = vpop.f32.mrf.mxu1 }
  0xc5   : > { %v712_v27 = vadd.f32 %v1685_v26, %v529_v24  ;;  %v720_v28 = vadd.f32 %v1685_v26, %v549_v25 }
  0xc7   : > { %v776_v33 = vmul.f32 0.2, %v712_v27  ;;  %v784_v34 = vmul.f32 0.2, %v720_v28  ;;  %vm744_vm0 = vcmp.ge.f32.partialorder %v712_v27, 0.0  ;;  %vm752_vm1 = vcmp.ge.f32.partialorder %v720_v28, 0.0 }
  0xc9   : > { %v808_v41 = vsel %vm744_vm0, %v712_v27, %v776_v33  ;;  %v816_v42 = vsel %vm752_vm1, %v720_v28, %v784_v34 }
  0xcb   : > { %v569_v29 = vpop.f32.mrf.mxu2  ;;  %v589_v30 = vpop.f32.mrf.mxu3 }
  0xcc   : > { %v531_v31 = vpop.f32.mrf.mxu0  ;;  %v551_v32 = vpop.f32.mrf.mxu1  ;;  %v728_v39 = vadd.f32 %v1685_v26, %v569_v29  ;;  %v736_v40 = vadd.f32 %v1685_v26, %v589_v30 }
  0xcd   : > { %v713_v35 = vadd.f32 %v1685_v26, %v531_v31  ;;  %v721_v36 = vadd.f32 %v1685_v26, %v551_v32 }
  0xce   : > { %v792_v49 = vmul.f32 0.2, %v728_v39  ;;  %v800_v50 = vmul.f32 0.2, %v736_v40  ;;  %vm760_vm4 = vcmp.ge.f32.partialorder %v728_v39, 0.0  ;;  %vm768_vm5 = vcmp.ge.f32.partialorder %v736_v40, 0.0 }
  0xcf   : > { %vm745_vm2 = vcmp.ge.f32.partialorder %v713_v35, 0.0  ;;  %v777_v37 = vmul.f32 0.2, %v713_v35  ;;  %vm753_vm3 = vcmp.ge.f32.partialorder %v721_v36, 0.0  ;;  %v785_v38 = vmul.f32 0.2, %v721_v36 }
  0xd0   : > { %v824_v57 = vsel %vm760_vm4, %v728_v39, %v792_v49  ;;  %v832_v58 = vsel %vm768_vm5, %v736_v40, %v800_v50 }
  0xd1   : > { %v809_v43 = vsel %vm745_vm2, %v713_v35, %v777_v37  ;;  %v817_v44 = vsel %vm753_vm3, %v721_v36, %v785_v38 }
  0xd2   : > { %v1178_v45 = vpack.c.bf16 %v809_v43, %v808_v41  ;;  %v1198_v46 = vpack.c.bf16 %v817_v44, %v816_v42 }
  0xd3   : > { %v571_v47 = vpop.f32.mrf.mxu2  ;;  %v591_v48 = vpop.f32.mrf.mxu3 }
  0xd4   : > { %1179 = vst [vmem:[%s1695_s22] sm:$0xff] %v1178_v45   ;;  %v729_v51 = vadd.f32 %v1685_v26, %v571_v47  ;;  %v737_v52 = vadd.f32 %v1685_v26, %v591_v48  ;;  %v534_v53 = vpop.f32.mrf.mxu0  ;;  %v554_v54 = vpop.f32.mrf.mxu1 }
  0xd5   : > { %1258 = vst [vmem:[%s1695_s22 + $0x20] sm:$0xff] %v1198_v46   ;;  %v714_v63 = vadd.f32 %v1685_v26, %v534_v53  ;;  %v722_v0 = vadd.f32 %v1685_v26, %v554_v54 }
  0xd6   : > { %vm761_vm6 = vcmp.ge.f32.partialorder %v729_v51, 0.0  ;;  %v793_v55 = vmul.f32 0.2, %v729_v51  ;;  %vm769_vm7 = vcmp.ge.f32.partialorder %v737_v52, 0.0  ;;  %v801_v56 = vmul.f32 0.2, %v737_v52 }
  0xd7   : > { %v778_v5 = vmul.f32 0.2, %v714_v63  ;;  %v786_v6 = vmul.f32 0.2, %v722_v0  ;;  %vm746_vm8 = vcmp.ge.f32.partialorder %v714_v63, 0.0  ;;  %vm754_vm9 = vcmp.ge.f32.partialorder %v722_v0, 0.0 }
  0xd8   : > { %v825_v59 = vsel %vm761_vm6, %v729_v51, %v793_v55  ;;  %v833_v60 = vsel %vm769_vm7, %v737_v52, %v801_v56 }
  0xd9   : > { %v1218_v61 = vpack.c.bf16 %v825_v59, %v824_v57  ;;  %v1238_v62 = vpack.c.bf16 %v833_v60, %v832_v58  ;;  %v810_v13 = vsel %vm746_vm8, %v714_v63, %v778_v5  ;;  %v818_v14 = vsel %vm754_vm9, %v722_v0, %v786_v6 }
  0xdb   : > { %1262 = vst [vmem:[%s1695_s22 + $0x40] sm:$0xff] %v1218_v61   ;;  %v574_v1 = vpop.f32.mrf.mxu2  ;;  %v594_v2 = vpop.f32.mrf.mxu3 }
  0xdc   : > { %1266 = vst [vmem:[%s1695_s22 + $0x60] sm:$0xff] %v1238_v62   ;;  %v536_v3 = vpop.f32.mrf.mxu0  ;;  %v556_v4 = vpop.f32.mrf.mxu1  ;;  %v730_v11 = vadd.f32 %v1685_v26, %v574_v1  ;;  %v738_v12 = vadd.f32 %v1685_v26, %v594_v2 }
  0xdd   : > { %v715_v7 = vadd.f32 %v1685_v26, %v536_v3  ;;  %v723_v8 = vadd.f32 %v1685_v26, %v556_v4 }
  0xde   : > { %v794_v21 = vmul.f32 0.2, %v730_v11  ;;  %v802_v22 = vmul.f32 0.2, %v738_v12  ;;  %vm762_vm12 = vcmp.ge.f32.partialorder %v730_v11, 0.0  ;;  %vm770_vm13 = vcmp.ge.f32.partialorder %v738_v12, 0.0 }
  0xdf   : > { %vm747_vm10 = vcmp.ge.f32.partialorder %v715_v7, 0.0  ;;  %v779_v9 = vmul.f32 0.2, %v715_v7  ;;  %vm755_vm11 = vcmp.ge.f32.partialorder %v723_v8, 0.0  ;;  %v787_v10 = vmul.f32 0.2, %v723_v8 }
  0xe0   : > { %v826_v30 = vsel %vm762_vm12, %v730_v11, %v794_v21  ;;  %v834_v31 = vsel %vm770_vm13, %v738_v12, %v802_v22 }
  0xe1   : > { %v811_v15 = vsel %vm747_vm10, %v715_v7, %v779_v9  ;;  %v819_v16 = vsel %vm755_vm11, %v723_v8, %v787_v10 }
  0xe2   : > { %v1183_v17 = vpack.c.bf16 %v811_v15, %v810_v13  ;;  %v1203_v18 = vpack.c.bf16 %v819_v16, %v818_v14 }
  0xe3   : > { %v576_v19 = vpop.f32.mrf.mxu2  ;;  %v596_v20 = vpop.f32.mrf.mxu3 }
  0xe4   : > { %1255 = vst [vmem:[%s1695_s22 + $0x8] sm:$0xff] %v1183_v17   ;;  %v731_v23 = vadd.f32 %v1685_v26, %v576_v19  ;;  %v739_v24 = vadd.f32 %v1685_v26, %v596_v20  ;;  %v539_v25 = vpop.f32.mrf.mxu0  ;;  %v559_v27 = vpop.f32.mrf.mxu1 }
  0xe5   : > { %1259 = vst [vmem:[%s1695_s22 + $0x28] sm:$0xff] %v1203_v18   ;;  %v716_v36 = vadd.f32 %v1685_v26, %v539_v25  ;;  %v724_v37 = vadd.f32 %v1685_v26, %v559_v27 }
  0xe6   : > { %vm763_vm14 = vcmp.ge.f32.partialorder %v731_v23, 0.0  ;;  %v795_v28 = vmul.f32 0.2, %v731_v23  ;;  %vm771_vm15 = vcmp.ge.f32.partialorder %v739_v24, 0.0  ;;  %v803_v29 = vmul.f32 0.2, %v739_v24 }
  0xe7   : > { %v780_v42 = vmul.f32 0.2, %v716_v36  ;;  %v788_v43 = vmul.f32 0.2, %v724_v37  ;;  %vm748_vm0 = vcmp.ge.f32.partialorder %v716_v36, 0.0  ;;  %vm756_vm1 = vcmp.ge.f32.partialorder %v724_v37, 0.0 }
  0xe8   : > { %v827_v32 = vsel %vm763_vm14, %v731_v23, %v795_v28  ;;  %v835_v33 = vsel %vm771_vm15, %v739_v24, %v803_v29 }
  0xe9   : > { %v1223_v34 = vpack.c.bf16 %v827_v32, %v826_v30  ;;  %v1243_v35 = vpack.c.bf16 %v835_v33, %v834_v31  ;;  %v812_v50 = vsel %vm748_vm0, %v716_v36, %v780_v42  ;;  %v820_v51 = vsel %vm756_vm1, %v724_v37, %v788_v43 }
  0xeb   : > { %1263 = vst [vmem:[%s1695_s22 + $0x48] sm:$0xff] %v1223_v34   ;;  %v579_v38 = vpop.f32.mrf.mxu2  ;;  %v599_v39 = vpop.f32.mrf.mxu3 }
  0xec   : > { %1267 = vst [vmem:[%s1695_s22 + $0x68] sm:$0xff] %v1243_v35   ;;  %v541_v40 = vpop.f32.mrf.mxu0  ;;  %v561_v41 = vpop.f32.mrf.mxu1  ;;  %v732_v48 = vadd.f32 %v1685_v26, %v579_v38  ;;  %v740_v49 = vadd.f32 %v1685_v26, %v599_v39 }
  0xed   : > { %v717_v44 = vadd.f32 %v1685_v26, %v541_v40  ;;  %v725_v45 = vadd.f32 %v1685_v26, %v561_v41 }
  0xee   : > { %v796_v58 = vmul.f32 0.2, %v732_v48  ;;  %v804_v59 = vmul.f32 0.2, %v740_v49  ;;  %vm764_vm4 = vcmp.ge.f32.partialorder %v732_v48, 0.0  ;;  %vm772_vm5 = vcmp.ge.f32.partialorder %v740_v49, 0.0 }
  0xef   : > { %vm749_vm2 = vcmp.ge.f32.partialorder %v717_v44, 0.0  ;;  %v781_v46 = vmul.f32 0.2, %v717_v44  ;;  %vm757_vm3 = vcmp.ge.f32.partialorder %v725_v45, 0.0  ;;  %v789_v47 = vmul.f32 0.2, %v725_v45 }
  0xf0   : > { %v828_v2 = vsel %vm764_vm4, %v732_v48, %v796_v58  ;;  %v836_v3 = vsel %vm772_vm5, %v740_v49, %v804_v59 }
  0xf1   : > { %v813_v52 = vsel %vm749_vm2, %v717_v44, %v781_v46  ;;  %v821_v53 = vsel %vm757_vm3, %v725_v45, %v789_v47 }
  0xf2   : > { %v1188_v54 = vpack.c.bf16 %v813_v52, %v812_v50  ;;  %v1208_v55 = vpack.c.bf16 %v821_v53, %v820_v51 }
  0xf3   : > { %v581_v56 = vpop.f32.mrf.mxu2  ;;  %v601_v57 = vpop.f32.mrf.mxu3 }
  0xf4   : > { %1256 = vst [vmem:[%s1695_s22 + $0x10] sm:$0xff] %v1188_v54   ;;  %v733_v60 = vadd.f32 %v1685_v26, %v581_v56  ;;  %v741_v61 = vadd.f32 %v1685_v26, %v601_v57  ;;  %v544_v62 = vpop.f32.mrf.mxu0  ;;  %v564_v63 = vpop.f32.mrf.mxu1 }
  0xf5   : > { %1260 = vst [vmem:[%s1695_s22 + $0x30] sm:$0xff] %v1208_v55   ;;  %v718_v8 = vadd.f32 %v1685_v26, %v544_v62  ;;  %v726_v9 = vadd.f32 %v1685_v26, %v564_v63 }
  0xf6   : > { %vm765_vm6 = vcmp.ge.f32.partialorder %v733_v60, 0.0  ;;  %v797_v0 = vmul.f32 0.2, %v733_v60  ;;  %vm773_vm7 = vcmp.ge.f32.partialorder %v741_v61, 0.0  ;;  %v805_v1 = vmul.f32 0.2, %v741_v61 }
  0xf7   : > { %v782_v14 = vmul.f32 0.2, %v718_v8  ;;  %v790_v15 = vmul.f32 0.2, %v726_v9  ;;  %vm750_vm8 = vcmp.ge.f32.partialorder %v718_v8, 0.0  ;;  %vm758_vm9 = vcmp.ge.f32.partialorder %v726_v9, 0.0 }
  0xf8   : > { %v829_v4 = vsel %vm765_vm6, %v733_v60, %v797_v0  ;;  %v837_v5 = vsel %vm773_vm7, %v741_v61, %v805_v1 }
  0xf9   : > { %v1228_v6 = vpack.c.bf16 %v829_v4, %v828_v2  ;;  %v1248_v7 = vpack.c.bf16 %v837_v5, %v836_v3  ;;  %v814_v22 = vsel %vm750_vm8, %v718_v8, %v782_v14  ;;  %v822_v23 = vsel %vm758_vm9, %v726_v9, %v790_v15 }
  0xfb   : > { %1264 = vst [vmem:[%s1695_s22 + $0x50] sm:$0xff] %v1228_v6   ;;  %v584_v10 = vpop.f32.mrf.mxu2  ;;  %v604_v11 = vpop.f32.mrf.mxu3 }
  0xfc   : > { %1268 = vst [vmem:[%s1695_s22 + $0x70] sm:$0xff] %v1248_v7   ;;  %v546_v12 = vpop.f32.mrf.mxu0  ;;  %v566_v13 = vpop.f32.mrf.mxu1  ;;  %v734_v20 = vadd.f32 %v1685_v26, %v584_v10  ;;  %v742_v21 = vadd.f32 %v1685_v26, %v604_v11 }
  0xfd   : > { %v719_v16 = vadd.f32 %v1685_v26, %v546_v12  ;;  %v727_v17 = vadd.f32 %v1685_v26, %v566_v13 }
  0xfe   : > { %v798_v31 = vmul.f32 0.2, %v734_v20  ;;  %v806_v32 = vmul.f32 0.2, %v742_v21  ;;  %vm766_vm12 = vcmp.ge.f32.partialorder %v734_v20, 0.0  ;;  %vm774_vm13 = vcmp.ge.f32.partialorder %v742_v21, 0.0 }
  0xff   : > { %vm751_vm10 = vcmp.ge.f32.partialorder %v719_v16, 0.0  ;;  %v783_v18 = vmul.f32 0.2, %v719_v16  ;;  %vm759_vm11 = vcmp.ge.f32.partialorder %v727_v17, 0.0  ;;  %v791_v19 = vmul.f32 0.2, %v727_v17 }
 0x100   : > { %v830_v37 = vsel %vm766_vm12, %v734_v20, %v798_v31  ;;  %v838_v38 = vsel %vm774_vm13, %v742_v21, %v806_v32 }
 0x101   : > { %v815_v24 = vsel %vm751_vm10, %v719_v16, %v783_v18  ;;  %v823_v25 = vsel %vm759_vm11, %v727_v17, %v791_v19 }
 0x102   : > { %v1193_v27 = vpack.c.bf16 %v815_v24, %v814_v22  ;;  %v1213_v28 = vpack.c.bf16 %v823_v25, %v822_v23 }
 0x103   : > { %v586_v29 = vpop.f32.mrf.mxu2  ;;  %v606_v30 = vpop.f32.mrf.mxu3 }
 0x104   : > { %1257 = vst [vmem:[%s1695_s22 + $0x18] sm:$0xff] %v1193_v27   ;;  %v735_v33 = vadd.f32 %v1685_v26, %v586_v29  ;;  %v743_v34 = vadd.f32 %v1685_v26, %v606_v30 }
 0x105   : > { %1261 = vst [vmem:[%s1695_s22 + $0x38] sm:$0xff] %v1213_v28  }
 0x106   : > { %vm767_vm14 = vcmp.ge.f32.partialorder %v735_v33, 0.0  ;;  %v799_v35 = vmul.f32 0.2, %v735_v33  ;;  %vm775_vm15 = vcmp.ge.f32.partialorder %v743_v34, 0.0  ;;  %v807_v36 = vmul.f32 0.2, %v743_v34 }
 0x108   : > { %v831_v39 = vsel %vm767_vm14, %v735_v33, %v799_v35  ;;  %v839_v40 = vsel %vm775_vm15, %v743_v34, %v807_v36 }
 0x109   : > { %v1233_v41 = vpack.c.bf16 %v831_v39, %v830_v37  ;;  %v1253_v42 = vpack.c.bf16 %v839_v40, %v838_v38 }
 0x10b   : > { %1265 = vst [vmem:[%s1695_s22 + $0x58] sm:$0xff] %v1233_v41  }
 0x10c   : > { %1269 = vst [vmem:[%s1695_s22 + $0x78] sm:$0xff] %v1253_v42  }
 0x10d   : > { %1459 = shalt.err (!%p1456_p0)
}
 0x10e   : > { %s1523_s6 = smov 64   ;;  %s1524_s7 = smov 4  }
 0x10f   : > { %1300 = dma.vmem_to_hbm [thread:$0]  (%p1627_p5), %s919_s10, 2048, %s921_s19, %s905_s24, %s1523_s6, %s1523_s6, %s1524_s7  }
 0x110 PF: > { %s935_s1 = sand.u32 1, %s1498_s12   ;;  %p1311_p3 = pnand %p1040_p11, %p1594_p6 }
 0x111   : > { %s936_s20 = scalar_lea.sflag [#allocation5], %s935_s1 }
 0x112   : > { %p1312_p7 = pneg %p1311_p3 }
 0x114   : > { %1493 = dma.done.wait (%p1312_p7), %s936_s20, 2048  }
 0x115   : > { %1495 = vsyncadd (%p1312_p7), %s936_s20, 4294965248  ;;  %s20_s17 = sadd.s32 1, %s1518_s17   ;;  %s1793_s12 = smov %s1502_s13 }
 0x116   : > { %p17_p9 = scmp.ge.s32.totalorder %s20_s17, 4   ;;  %s1794_s13 = smov %s1506_s14 }
 0x117   : > { %s1795_s14 = smov %s1636_s18  ;;  %s1796_s15 = smov %s1514_s16 }
 0x118   : > { %s1797_s16 = smov %s1799_s5  ;;  %19 = sbr.rel (!%p17_p9) target bundleno = 9 (0x9), region = 93 }
 0x11d   :  { %942 = vsyncpa [#allocation4], 1 }
 0x11e   :  { %944 = vsyncpa [#allocation4 + $0x1], 1 }
 0x11f   :  { %945 = vsyncpa [#allocation7], 1 }
 0x120   :  { %946 = vsyncpa [#allocation5], 1 }
 0x121   :  { %948 = vsyncpa [#allocation5 + $0x1], 1 }

</bundles_post_ra>
